<compile_context>
chip_gen: v6e
topology: v6e:2x2x1
jax: 0.10.0
libtpu: 0.0.40
codegen_flags: <defaults>
</compile_context>

<pallas_src>
import numpy as np
import jax
import jax.numpy as jnp
from jax.experimental import pallas as pl
from jax.experimental.pallas import tpu as pltpu

_LANES = 128  # vreg lane width; last dim is a multiple of 128 -> unmasked vst


def _round_up(a: int, m: int) -> int:
    return ((a + m - 1) // m) * m


def _cdiv(a: int, b: int) -> int:
    return -(-a // b)


def _sublane_multiple(dtype) -> int:
    # Sub-32-bit dtypes pack along sublanes: f32 -> 8, bf16/f16 -> 16, int8/fp8 -> 32.
    itemsize = jnp.dtype(dtype).itemsize
    return max(8, 32 // max(1, itemsize))


def _vmem_budget_bytes() -> int:
    """Generation-aware VMEM budget (leaves headroom for compiler scratch)."""
    phys = None
    try:
        info = pltpu.get_tpu_info()
        phys = int(getattr(info, "vmem_capacity_bytes", 0)) or None
    except Exception:
        phys = None
    if phys is None:
        phys = 64 << 20  # conservative fallback: v7x per-TensorCore VMEM
    # 55% of physical: ~70 MiB on v5e/v6e (128 MiB), ~35 MiB on v7x (64 MiB).
    return max(8 << 20, int(phys * 0.55))


def _shallow_copy_kernel(x_ref, *out_refs):
    # x_ref:    (tile_rows, 128)
    # out_refs: n-1 refs of (tile_rows, 128)
    v = x_ref[...]
    for o in out_refs:
        o[...] = v


def shallow_copy(x, n, *, target_tile_bytes=2 << 20, min_kernel_bytes=1 << 20):
    """Pallas implementation of ShallowCopy.forward: returns a tuple of n copies.

    The first element aliases `x` (exactly PyTorch's semantics); the other
    n-1 elements are materialized by a Pallas copy kernel. Small inputs and
    n <= 1 take a zero-cost alias fast path.
    """
    if n <= 0:
        return ()

    x = jnp.asarray(x)
    orig_shape = x.shape
    dtype = x.dtype
    itemsize = jnp.dtype(dtype).itemsize
    total = int(np.prod(orig_shape)) if orig_shape else 1

    n_copies = n - 1  # first output is x itself
    # Fast path: aliasing is semantically exact and strictly faster for tiny
    # tensors (per-grid-step + launch overhead dominates) and for n == 1.
    if n_copies == 0 or total == 0 or total * itemsize < min_kernel_bytes:
        return (x,) * n

    sub = _sublane_multiple(dtype)
    per_row_bytes = _LANES * itemsize

    # Lane-dense layout: flatten -> (rows, 128), padded only to sublane granularity.
    rows = _cdiv(total, _LANES)
    rows_pad = _round_up(rows, sub)

    # Tile selection: ~2 MiB per buffer (HBM-roofline sweet spot), capped so
    # (1 input + n_copies outputs) double-buffered tiles stay under the
    # generation-aware VMEM budget.
    budget = _vmem_budget_bytes()
    cap_tile_bytes = budget // ((n_copies + 1) * 2)
    tile_bytes = max(sub * per_row_bytes, min(target_tile_bytes, cap_tile_bytes))
    tile_rows = max(sub, (tile_bytes // per_row_bytes) // sub * sub)
    tile_rows = min(tile_rows, rows_pad)
    # Keep >= 2 grid steps when there is more than one minimal tile of work,
    # so the "parallel" grid axis can be sharded across v7x's two TensorCores.
    if rows_pad > sub:
        tile_rows = min(tile_rows, _round_up(_cdiv(rows_pad, 2), sub))
    tile_rows = max(sub, (tile_rows // sub) * sub)

    grid = (_cdiv(rows_pad, tile_rows),)  # last block may be partial; Pallas clips it
    padded_total = rows_pad * _LANES

    x_flat = x.reshape(-1)
    needs_pad = padded_total != total
    if needs_pad:
        x_flat = jnp.pad(x_flat, (0, padded_total - total))
    x2d = x_flat.reshape(rows_pad, _LANES)

    cost = pl.CostEstimate(
        flops=0,
        transcendentals=0,
        bytes_accessed=(n_copies + 1) * padded_total * itemsize,
    )

    copies = pl.pallas_call(
        _shallow_copy_kernel,
        out_shape=tuple(
            jax.ShapeDtypeStruct((rows_pad, _LANES), dtype) for _ in range(n_copies)
        ),
        grid_spec=pltpu.PrefetchScalarGridSpec(
            num_scalar_prefetch=0,
            grid=grid,
            in_specs=[pl.BlockSpec((tile_rows, _LANES), lambda i: (i, 0))],
            out_specs=tuple(
                pl.BlockSpec((tile_rows, _LANES), lambda i: (i, 0))
                for _ in range(n_copies)
            ),
        ),
        compiler_params=pltpu.CompilerParams(
            dimension_semantics=("parallel",),
            vmem_limit_bytes=int(budget),
        ),
        cost_estimate=cost,
    )(x2d)

    if not isinstance(copies, (tuple, list)):
        copies = (copies,)

    def _restore(o):
        o_flat = o.reshape(-1)
        if needs_pad:
            o_flat = o_flat[:total]
        return o_flat.reshape(orig_shape)

    return (x,) + tuple(_restore(o) for o in copies)


def shallow_copy_ref(x, n):
    """Pure-JAX reference mirroring the PyTorch forward."""
    return (x,) * n


if __name__ == "__main__":
    key = jax.random.PRNGKey(0)
    k1, k2, k3, k4, k5 = jax.random.split(key, 5)

    cases = []

    # 1) Module-shaped small input: alias fast path (zero data movement).
    cases.append((jax.random.normal(k1, (2, 4, 16, 16), dtype=jnp.float32), 3, {}))

    # 2) Force the Pallas kernel: evenly tiled f32, grid >= 2 (megacore).
    cases.append((jax.random.normal(k2, (4, 8, 32, 128), dtype=jnp.float32), 3,
                  dict(min_kernel_bytes=0)))

    # 3) Ragged element count -> sublane pad / slice path.
    cases.append((jax.random.normal(k3, (3, 5, 7, 11), dtype=jnp.float32), 2,
                  dict(min_kernel_bytes=0)))

    # 4) Rows not divisible by tile_rows -> partial edge block, no pad.
    cases.append((jax.random.normal(k4, (3, 1024), dtype=jnp.float32), 2,
                  dict(min_kernel_bytes=0)))

    # 5) bf16 input -> 16-row sublane packing.
    cases.append((jax.random.normal(k5, (2, 4, 16, 16), dtype=jnp.float32)
                  .astype(jnp.bfloat16), 4, dict(min_kernel_bytes=0)))

    for x, n, kwargs in cases:
        outs = jax.block_until_ready(shallow_copy(x, n, **kwargs))
        refs = shallow_copy_ref(x, n)
        assert isinstance(outs, tuple) and len(outs) == n, (type(outs), len(outs), n)
        for o, r in zip(outs, refs):
            assert o.shape == r.shape, (o.shape, r.shape)
            assert o.dtype == r.dtype, (o.dtype, r.dtype)
            np.testing.assert_array_equal(np.asarray(o), np.asarray(r))

    print("KERNEL_OK")
</pallas_src>

<mosaic_0001>
module attributes {stable_mosaic.version = 11 : i64} {
  func.func @_shallow_copy_kernel(%arg0: i32, %arg1: memref<512x128xf32, #tpu.memory_space<vmem>>, %arg2: memref<512x128xf32, #tpu.memory_space<vmem>>, %arg3: memref<512x128xf32, #tpu.memory_space<vmem>>) attributes {dimension_semantics = [#tpu.dimension_semantics<parallel>], iteration_bounds = array<i64: 2>, scalar_prefetch = 0 : i64, scratch_operands = 0 : i64, tpu.core_type = #tpu.core_type<tc>, window_params = [{transform_indices = @transform_0, window_bounds = array<i64: 512, 128>}, {transform_indices = @transform_1, window_bounds = array<i64: 512, 128>}, {transform_indices = @transform_2, window_bounds = array<i64: 512, 128>}]} {
    %c0 = arith.constant 0 : index
    %c0_0 = arith.constant 0 : index
    %0 = vector.load %arg1[%c0, %c0_0] : memref<512x128xf32, #tpu.memory_space<vmem>>, vector<512x128xf32>
    %c0_1 = arith.constant 0 : index
    %c0_2 = arith.constant 0 : index
    %1 = vector.load %arg2[%c0_1, %c0_2] : memref<512x128xf32, #tpu.memory_space<vmem>>, vector<512x128xf32>
    tpu.vector_store %arg2[%c0_1, %c0_2], %0 {strides = array<i32>} : memref<512x128xf32, #tpu.memory_space<vmem>>, vector<512x128xf32>,
    %c0_3 = arith.constant 0 : index
    %c0_4 = arith.constant 0 : index
    %2 = vector.load %arg3[%c0_3, %c0_4] : memref<512x128xf32, #tpu.memory_space<vmem>>, vector<512x128xf32>
    tpu.vector_store %arg3[%c0_3, %c0_4], %0 {strides = array<i32>} : memref<512x128xf32, #tpu.memory_space<vmem>>, vector<512x128xf32>,
    return
  }
  func.func @transform_0(%arg0: i32) -> (i32, i32) {
    %c0_i32 = arith.constant 0 : i32
    %c0_i32_0 = arith.constant 0 : i32
    return %arg0, %c0_i32 : i32, i32
  }
  func.func @transform_1(%arg0: i32) -> (i32, i32) {
    %c0_i32 = arith.constant 0 : i32
    %c0_i32_0 = arith.constant 0 : i32
    return %arg0, %c0_i32 : i32, i32
  }
  func.func @transform_2(%arg0: i32) -> (i32, i32) {
    %c0_i32 = arith.constant 0 : i32
    %c0_i32_0 = arith.constant 0 : i32
    return %arg0, %c0_i32 : i32, i32
  }
}

</mosaic_0001>

<bundles_post_ra>
// kernel: tpu_custom_call.1
= control target key start
LH: loop header
LB: loop body
LE: loop exit
PB: predicated region body
PF: predicated region fallthrough
CT: control target
= control target key end

     0   :  { %8 = vsyncpa [#allocation3], 0  ;;  %s1124_s0 = inlined_call_operand.hbm [shape: f32[1024,128], index: 0, kind: input, shape index: {}]   ;;  %s1125_s1 = inlined_call_operand.hbm [shape: f32[1024,128], index: 1, kind: output, shape index: {0}]   ;;  %s1126_s2 = inlined_call_operand.hbm [shape: f32[1024,128], index: 2, kind: output, shape index: {1}]  }
   0x1   :  { %10 = vsyncpa [#allocation3 + $0x1], 0 }
   0x2   :  { %11 = vsyncpa [#allocation4], 0 }
   0x3   :  { %13 = vsyncpa [#allocation4 + $0x1], 0 }
   0x4   :  { %14 = vsyncpa [#allocation7], 0 }
   0x5   :  { %16 = vsyncpa [#allocation7 + $0x1], 0  ;;  %s730_s9 = smov 0   ;;  %s732_s10 = smov 0  }
   0x6   :  { %s734_s11 = smov 0   ;;  %s736_s12 = smov 0  }
   0x7 LB: > { %s751_s13 = sadd.s32 4294967295, %s706_s12   ;;  %s508_s14 = sadd.s32 4294967294, %s706_s12   ;;  %s706_s12 = sphi %s736_s12, %s1141_s12   ;;  %s702_s11 = sphi %s734_s11, %s1140_s11   ;;  %s698_s10 = sphi %s732_s10, %s1139_s10   ;;  %s694_s9 = sphi %s730_s9, %s1138_s9  }
   0x8   : > { %s755_s15 = sadd.s32 1, %s706_s12   ;;  %s29_s16 = sadd.s32 1, %s702_s11 }
   0x9   : > { %s26_s17 = ssub.s32 %s706_s12, %s755_s15  ;;  %p36_p0 = scmp.ne.s32.totalorder %s702_s11, %s698_s10 }
   0xa   : > { %p27_p1 = scmp.eq.s32.totalorder %s26_s17, 0  ;;  %p37_p2 = scmp.eq.s32.totalorder %s706_s12, 0 }
   0xb   : > { %p42_p3 = scmp.ne.s32.totalorder %s698_s10, %s694_s9  ;;  %p43_p4 = scmp.eq.s32.totalorder %s751_s13, 0 }
   0xc   : > { %s767_s18 = scalar_select %p27_p1, %s702_s11, %s29_s16  }
   0xd   : > { %p769_p5 = por %p37_p2, %p36_p0  ;;  %p773_p6 = por %p43_p4, %p42_p3 }
   0xe   : > { %p66_p7 = scmp.eq.s32.totalorder %s751_s13, 1  ;;  %p72_p8 = scmp.eq.s32.totalorder %s508_s14, 1 }
   0xf   : > { %s1130_s20 = scalar_select %p773_p6, 1, 0 }
  0x10   : > { %p546_p10 = scmp.lt.s32.totalorder %s706_s12, 2  ;;  %p780_p11 = por %p66_p7, %p36_p0 }
  0x11   : > { %p784_p12 = por %p72_p8, %p42_p3  ;;  %s118_s23 = sand.u32 1, %s702_s11  }
  0x12   : > { %s1131_s21 = scalar_select %p780_p11, 1, 0 }
  0x13   : > { %s1132_s22 = scalar_select %p784_p12, 1, 0 }
  0x14   : > { %s526_s24 = sshll.u32 %s706_s12, 13  ;;  %s511_s25 = sshll.u32 %s118_s23, 9 }
  0x15   : > { %s793_s28 = scalar_lea.hbm %s1124_s0, %s526_s24  ;;  %s122_s29 = scalar_lea.vmem [#allocation2], %s511_s25 }
  0x16   : > { %s129_s30 = sshll.u32 %s122_s29, 4  ;;  %p797_p13 = pnand %p546_p10, %p769_p5  ;;  %s801_s30 = int_to_ptr.vmem [resolvable:$true] %s129_s30 }
  0x17   : > { %s803_s4 = scalar_lea.sflag [#allocation3], %s118_s23  ;;  %s584_s5 = scalar_lea.hbm %s793_s28, 8192 }
  0x18   : > { %p585_p0 = scmp.ne.s32.totalorder %s793_s28, %s584_s5  ;;  %p586_p1 = pneg %p797_p13 }
  0x19   : > { %s589_s8 = scalar_lea.hbm %s1124_s0, 16384  ;;  %p590_p4 = scmp.lt.s32.totalorder %s793_s28, %s1124_s0 }
  0x1a   : > { %p587_p2 = pnand %p586_p1, %p585_p0  ;;  %p591_p5 = scmp.lt.s32.totalorder %s589_s8, %s584_s5 }
  0x1c   : > { %p588_p3 = pneg %p587_p2  ;;  %p592_p7 = por %p591_p5, %p590_p4 }
  0x1e   : > { %p593_p8 = pnand %p592_p7, %p588_p3 }
  0x20   : > { %596 = shalt.err (!%p593_p8)
}
  0x21   : > { %s597_s17 = scalar_lea.vmem %s801_s30, 8192  ;;  %s708_s19 = smov [#allocation2]  }
  0x22   : > { %p598_p10 = scmp.ne.s32.totalorder %s801_s30, %s597_s17  ;;  %s602_s23 = sshll.u32 %s708_s19, 4  ;;  %s603_s23 = int_to_ptr.vmem [resolvable:$false] %s602_s23 }
  0x23   : > { %s604_s24 = scalar_lea.vmem %s603_s23, 16384  ;;  %p605_p2 = scmp.lt.s32.totalorder %s801_s30, %s603_s23 }
  0x24   : > { %p600_p9 = pnand %p598_p10, %p586_p1  ;;  %p606_p12 = scmp.lt.s32.totalorder %s604_s24, %s597_s17 }
  0x26   : > { %p601_p0 = pneg %p600_p9  ;;  %p607_p11 = por %p606_p12, %p605_p2 }
  0x28   : > { %p608_p6 = pnand %p607_p11, %p601_p0 }
  0x2a   : > { %611 = shalt.err (!%p608_p6)
}
  0x2b   : > { %s709_s25 = smov 128   ;;  %s710_s26 = smov 8  }
  0x2c   : > { %538 = dma.hbm_to_vmem [thread:$0]  (!%p797_p13), %s793_s28, 8192, %s801_s30, %s803_s4, %s709_s25, %s709_s25, %s710_s26  }
  0x2d   : > { %p514_p9 = scmp.ge.s32.totalorder %s706_s12, 1  ;;  %p137_p1 = scmp.lt.s32.totalorder %s706_s12, 3 }
  0x2f   : > { %p138_p3 = pnand %p514_p9, %p137_p1 }
  0x30   : > { %s827_s27 = sand.u32 (!%p138_p3), 1, %s698_s10   ;;  %p1134_p6 = scmp.ne.s32.totalorder (!%p138_p3), %s1130_s20, 0 }
  0x31   : > { %141 = sbr.rel (%p138_p3) target bundleno = 155 (0x9b), region = 24  ;;  %s515_s29 = sshll.u32 (!%p138_p3), %s827_s27, 9 }
  0x32   : > { %s144_s5 = scalar_lea.sflag (!%p138_p3), [#allocation3], %s827_s27  ;;  %s831_s6 = scalar_lea.vmem (!%p138_p3), [#allocation2], %s515_s29 }
  0x36   : > { %681 = dma.done.wait (%p1134_p6), %s144_s5, 8192  }
  0x37   : > { %683 = vsyncadd (%p1134_p6), %s144_s5, 4294959104  ;;  %v176_v0 = vld [vmem:[%s831_s6] sm:$0xff]  ;;  %v177_v1 = vld [vmem:[%s831_s6 + $0x8] sm:$0xff]  ;;  %s840_s28 = scalar_lea.vmem [#allocation5], %s515_s29  ;;  %s848_s20 = scalar_lea.vmem [#allocation6], %s515_s29 }
  0x38   : > { %v178_v2 = vld [vmem:[%s831_s6 + $0x10] sm:$0xff]  ;;  %240 = vst [vmem:[%s840_s28] sm:$0xff] %v176_v0  ;;  %241 = vst [vmem:[%s840_s28 + $0x8] sm:$0xff] %v177_v1  ;;  %v179_v3 = vld [vmem:[%s831_s6 + $0x18] sm:$0xff]  ;;  %s527_s30 = sshll.u32 %s751_s13, 13  ;;  %s387_s3 = sshll.u32 %s840_s28, 4  ;;  %s1027_s3 = int_to_ptr.vmem [resolvable:$true] %s387_s3 }
  0x39   : > { %242 = vst [vmem:[%s840_s28 + $0x10] sm:$0xff] %v178_v2  ;;  %v180_v4 = vld [vmem:[%s831_s6 + $0x20] sm:$0xff]  ;;  %v181_v5 = vld [vmem:[%s831_s6 + $0x28] sm:$0xff]  ;;  %304 = vst [vmem:[%s848_s20] sm:$0xff] %v176_v0  ;;  %s1013_s8 = scalar_lea.hbm %s1125_s1, %s527_s30  ;;  %s403_s14 = sshll.u32 %s848_s20, 4  ;;  %s1052_s14 = int_to_ptr.vmem [resolvable:$true] %s403_s14 }
  0x3a   : > { %305 = vst [vmem:[%s848_s20 + $0x8] sm:$0xff] %v177_v1  ;;  %306 = vst [vmem:[%s848_s20 + $0x10] sm:$0xff] %v178_v2  ;;  %v182_v6 = vld [vmem:[%s831_s6 + $0x30] sm:$0xff]  ;;  %v183_v7 = vld [vmem:[%s831_s6 + $0x38] sm:$0xff]  ;;  %s1050_s19 = scalar_lea.hbm %s1126_s2, %s527_s30  ;;  %s369_s23 = scalar_lea.sflag [#allocation4], %s827_s27 }
  0x3b   : > { %243 = vst [vmem:[%s840_s28 + $0x18] sm:$0xff] %v179_v3  ;;  %244 = vst [vmem:[%s840_s28 + $0x20] sm:$0xff] %v180_v4  ;;  %v184_v8 = vld [vmem:[%s831_s6 + $0x40] sm:$0xff]  ;;  %v185_v9 = vld [vmem:[%s831_s6 + $0x48] sm:$0xff]  ;;  %s612_s24 = scalar_lea.vmem %s1027_s3, 8192  ;;  %p1135_p12 = scmp.ne.s32.totalorder %s1131_s21, 0 }
  0x3c   : > { %245 = vst [vmem:[%s840_s28 + $0x28] sm:$0xff] %v181_v5  ;;  %307 = vst [vmem:[%s848_s20 + $0x18] sm:$0xff] %v179_v3  ;;  %v186_v10 = vld [vmem:[%s831_s6 + $0x50] sm:$0xff]  ;;  %v187_v11 = vld [vmem:[%s831_s6 + $0x58] sm:$0xff]  ;;  %p613_p11 = scmp.ne.s32.totalorder %s1027_s3, %s612_s24  ;;  %s711_s25 = smov [#allocation5]  }
  0x3d   : > { %308 = vst [vmem:[%s848_s20 + $0x20] sm:$0xff] %v180_v4  ;;  %309 = vst [vmem:[%s848_s20 + $0x28] sm:$0xff] %v181_v5  ;;  %v188_v12 = vld [vmem:[%s831_s6 + $0x60] sm:$0xff]  ;;  %v189_v13 = vld [vmem:[%s831_s6 + $0x68] sm:$0xff]  ;;  %s616_s26 = sshll.u32 %s711_s25, 4  ;;  %s617_s26 = int_to_ptr.vmem [resolvable:$false] %s616_s26 }
  0x3e   : > { %246 = vst [vmem:[%s840_s28 + $0x30] sm:$0xff] %v182_v6  ;;  %247 = vst [vmem:[%s840_s28 + $0x38] sm:$0xff] %v183_v7  ;;  %v190_v14 = vld [vmem:[%s831_s6 + $0x70] sm:$0xff]  ;;  %v191_v15 = vld [vmem:[%s831_s6 + $0x78] sm:$0xff]  ;;  %p614_p13 = pnand %p613_p11, %p1135_p12  ;;  %s618_s29 = scalar_lea.vmem %s617_s26, 16384 }
  0x3f   : > { %248 = vst [vmem:[%s840_s28 + $0x40] sm:$0xff] %v184_v8  ;;  %310 = vst [vmem:[%s848_s20 + $0x30] sm:$0xff] %v182_v6  ;;  %v192_v16 = vld [vmem:[%s831_s6 + $0x80] sm:$0xff]  ;;  %v193_v17 = vld [vmem:[%s831_s6 + $0x88] sm:$0xff]  ;;  %p619_p5 = scmp.lt.s32.totalorder %s1027_s3, %s617_s26  ;;  %p620_p7 = scmp.lt.s32.totalorder %s618_s29, %s612_s24 }
  0x40   : > { %311 = vst [vmem:[%s848_s20 + $0x38] sm:$0xff] %v183_v7  ;;  %312 = vst [vmem:[%s848_s20 + $0x40] sm:$0xff] %v184_v8  ;;  %v194_v18 = vld [vmem:[%s831_s6 + $0x90] sm:$0xff]  ;;  %v195_v19 = vld [vmem:[%s831_s6 + $0x98] sm:$0xff]  ;;  %p615_p4 = pneg %p614_p13 }
  0x41   : > { %249 = vst [vmem:[%s840_s28 + $0x48] sm:$0xff] %v185_v9  ;;  %250 = vst [vmem:[%s840_s28 + $0x50] sm:$0xff] %v186_v10  ;;  %v196_v20 = vld [vmem:[%s831_s6 + $0xa0] sm:$0xff]  ;;  %v197_v21 = vld [vmem:[%s831_s6 + $0xa8] sm:$0xff]  ;;  %p621_p8 = por %p620_p7, %p619_p5 }
  0x42   : > { %251 = vst [vmem:[%s840_s28 + $0x58] sm:$0xff] %v187_v11  ;;  %313 = vst [vmem:[%s848_s20 + $0x48] sm:$0xff] %v185_v9  ;;  %v198_v22 = vld [vmem:[%s831_s6 + $0xb0] sm:$0xff]  ;;  %v199_v23 = vld [vmem:[%s831_s6 + $0xb8] sm:$0xff] }
  0x43   : > { %314 = vst [vmem:[%s848_s20 + $0x50] sm:$0xff] %v186_v10  ;;  %315 = vst [vmem:[%s848_s20 + $0x58] sm:$0xff] %v187_v11  ;;  %v200_v24 = vld [vmem:[%s831_s6 + $0xc0] sm:$0xff]  ;;  %v201_v25 = vld [vmem:[%s831_s6 + $0xc8] sm:$0xff]  ;;  %p622_p10 = pnand %p621_p8, %p615_p4 }
  0x44   : > { %252 = vst [vmem:[%s840_s28 + $0x60] sm:$0xff] %v188_v12  ;;  %253 = vst [vmem:[%s840_s28 + $0x68] sm:$0xff] %v189_v13  ;;  %v202_v26 = vld [vmem:[%s831_s6 + $0xd0] sm:$0xff]  ;;  %v203_v27 = vld [vmem:[%s831_s6 + $0xd8] sm:$0xff] }
  0x45   : > { %254 = vst [vmem:[%s840_s28 + $0x70] sm:$0xff] %v190_v14  ;;  %316 = vst [vmem:[%s848_s20 + $0x60] sm:$0xff] %v188_v12  ;;  %v204_v28 = vld [vmem:[%s831_s6 + $0xe0] sm:$0xff]  ;;  %v205_v29 = vld [vmem:[%s831_s6 + $0xe8] sm:$0xff] }
  0x46   : > { %317 = vst [vmem:[%s848_s20 + $0x68] sm:$0xff] %v189_v13  ;;  %318 = vst [vmem:[%s848_s20 + $0x70] sm:$0xff] %v190_v14  ;;  %v206_v30 = vld [vmem:[%s831_s6 + $0xf0] sm:$0xff]  ;;  %v207_v31 = vld [vmem:[%s831_s6 + $0xf8] sm:$0xff] }
  0x47   : > { %255 = vst [vmem:[%s840_s28 + $0x78] sm:$0xff] %v191_v15  ;;  %256 = vst [vmem:[%s840_s28 + $0x80] sm:$0xff] %v192_v16  ;;  %v208_v32 = vld [vmem:[%s831_s6 + $0x100] sm:$0xff]  ;;  %v209_v33 = vld [vmem:[%s831_s6 + $0x108] sm:$0xff] }
  0x48   : > { %257 = vst [vmem:[%s840_s28 + $0x88] sm:$0xff] %v193_v17  ;;  %319 = vst [vmem:[%s848_s20 + $0x78] sm:$0xff] %v191_v15  ;;  %v210_v34 = vld [vmem:[%s831_s6 + $0x110] sm:$0xff]  ;;  %v211_v35 = vld [vmem:[%s831_s6 + $0x118] sm:$0xff] }
  0x49   : > { %320 = vst [vmem:[%s848_s20 + $0x80] sm:$0xff] %v192_v16  ;;  %321 = vst [vmem:[%s848_s20 + $0x88] sm:$0xff] %v193_v17  ;;  %v212_v36 = vld [vmem:[%s831_s6 + $0x120] sm:$0xff]  ;;  %v213_v37 = vld [vmem:[%s831_s6 + $0x128] sm:$0xff] }
  0x4a   : > { %258 = vst [vmem:[%s840_s28 + $0x90] sm:$0xff] %v194_v18  ;;  %259 = vst [vmem:[%s840_s28 + $0x98] sm:$0xff] %v195_v19  ;;  %v214_v38 = vld [vmem:[%s831_s6 + $0x130] sm:$0xff]  ;;  %v215_v39 = vld [vmem:[%s831_s6 + $0x138] sm:$0xff] }
  0x4b   : > { %260 = vst [vmem:[%s840_s28 + $0xa0] sm:$0xff] %v196_v20  ;;  %322 = vst [vmem:[%s848_s20 + $0x90] sm:$0xff] %v194_v18  ;;  %v216_v40 = vld [vmem:[%s831_s6 + $0x140] sm:$0xff]  ;;  %v217_v41 = vld [vmem:[%s831_s6 + $0x148] sm:$0xff] }
  0x4c   : > { %323 = vst [vmem:[%s848_s20 + $0x98] sm:$0xff] %v195_v19  ;;  %324 = vst [vmem:[%s848_s20 + $0xa0] sm:$0xff] %v196_v20  ;;  %v218_v42 = vld [vmem:[%s831_s6 + $0x150] sm:$0xff]  ;;  %v219_v43 = vld [vmem:[%s831_s6 + $0x158] sm:$0xff] }
  0x4d   : > { %261 = vst [vmem:[%s840_s28 + $0xa8] sm:$0xff] %v197_v21  ;;  %262 = vst [vmem:[%s840_s28 + $0xb0] sm:$0xff] %v198_v22  ;;  %v220_v44 = vld [vmem:[%s831_s6 + $0x160] sm:$0xff]  ;;  %v221_v45 = vld [vmem:[%s831_s6 + $0x168] sm:$0xff] }
  0x4e   : > { %263 = vst [vmem:[%s840_s28 + $0xb8] sm:$0xff] %v199_v23  ;;  %325 = vst [vmem:[%s848_s20 + $0xa8] sm:$0xff] %v197_v21  ;;  %v222_v46 = vld [vmem:[%s831_s6 + $0x170] sm:$0xff]  ;;  %v223_v47 = vld [vmem:[%s831_s6 + $0x178] sm:$0xff] }
  0x4f   : > { %326 = vst [vmem:[%s848_s20 + $0xb0] sm:$0xff] %v198_v22  ;;  %327 = vst [vmem:[%s848_s20 + $0xb8] sm:$0xff] %v199_v23  ;;  %v224_v48 = vld [vmem:[%s831_s6 + $0x180] sm:$0xff]  ;;  %v225_v49 = vld [vmem:[%s831_s6 + $0x188] sm:$0xff] }
  0x50   : > { %264 = vst [vmem:[%s840_s28 + $0xc0] sm:$0xff] %v200_v24  ;;  %265 = vst [vmem:[%s840_s28 + $0xc8] sm:$0xff] %v201_v25  ;;  %v226_v50 = vld [vmem:[%s831_s6 + $0x190] sm:$0xff]  ;;  %v227_v51 = vld [vmem:[%s831_s6 + $0x198] sm:$0xff] }
  0x51   : > { %266 = vst [vmem:[%s840_s28 + $0xd0] sm:$0xff] %v202_v26  ;;  %328 = vst [vmem:[%s848_s20 + $0xc0] sm:$0xff] %v200_v24  ;;  %v228_v52 = vld [vmem:[%s831_s6 + $0x1a0] sm:$0xff]  ;;  %v229_v53 = vld [vmem:[%s831_s6 + $0x1a8] sm:$0xff] }
  0x52   : > { %329 = vst [vmem:[%s848_s20 + $0xc8] sm:$0xff] %v201_v25  ;;  %330 = vst [vmem:[%s848_s20 + $0xd0] sm:$0xff] %v202_v26  ;;  %v230_v54 = vld [vmem:[%s831_s6 + $0x1b0] sm:$0xff]  ;;  %v231_v55 = vld [vmem:[%s831_s6 + $0x1b8] sm:$0xff] }
  0x53   : > { %267 = vst [vmem:[%s840_s28 + $0xd8] sm:$0xff] %v203_v27  ;;  %268 = vst [vmem:[%s840_s28 + $0xe0] sm:$0xff] %v204_v28  ;;  %v232_v56 = vld [vmem:[%s831_s6 + $0x1c0] sm:$0xff]  ;;  %v233_v57 = vld [vmem:[%s831_s6 + $0x1c8] sm:$0xff] }
  0x54   : > { %269 = vst [vmem:[%s840_s28 + $0xe8] sm:$0xff] %v205_v29  ;;  %331 = vst [vmem:[%s848_s20 + $0xd8] sm:$0xff] %v203_v27  ;;  %v234_v58 = vld [vmem:[%s831_s6 + $0x1d0] sm:$0xff]  ;;  %v235_v59 = vld [vmem:[%s831_s6 + $0x1d8] sm:$0xff] }
  0x55   : > { %332 = vst [vmem:[%s848_s20 + $0xe0] sm:$0xff] %v204_v28  ;;  %333 = vst [vmem:[%s848_s20 + $0xe8] sm:$0xff] %v205_v29  ;;  %v236_v60 = vld [vmem:[%s831_s6 + $0x1e0] sm:$0xff]  ;;  %v237_v61 = vld [vmem:[%s831_s6 + $0x1e8] sm:$0xff] }
  0x56   : > { %270 = vst [vmem:[%s840_s28 + $0xf0] sm:$0xff] %v206_v30  ;;  %271 = vst [vmem:[%s840_s28 + $0xf8] sm:$0xff] %v207_v31  ;;  %v238_v62 = vld [vmem:[%s831_s6 + $0x1f0] sm:$0xff]  ;;  %v239_v63 = vld [vmem:[%s831_s6 + $0x1f8] sm:$0xff] }
  0x57   : > { %272 = vst [vmem:[%s840_s28 + $0x100] sm:$0xff] %v208_v32  ;;  %334 = vst [vmem:[%s848_s20 + $0xf0] sm:$0xff] %v206_v30 }
  0x58   : > { %335 = vst [vmem:[%s848_s20 + $0xf8] sm:$0xff] %v207_v31  ;;  %336 = vst [vmem:[%s848_s20 + $0x100] sm:$0xff] %v208_v32 }
  0x59   : > { %273 = vst [vmem:[%s840_s28 + $0x108] sm:$0xff] %v209_v33  ;;  %274 = vst [vmem:[%s840_s28 + $0x110] sm:$0xff] %v210_v34 }
  0x5a   : > { %275 = vst [vmem:[%s840_s28 + $0x118] sm:$0xff] %v211_v35  ;;  %337 = vst [vmem:[%s848_s20 + $0x108] sm:$0xff] %v209_v33 }
  0x5b   : > { %338 = vst [vmem:[%s848_s20 + $0x110] sm:$0xff] %v210_v34  ;;  %339 = vst [vmem:[%s848_s20 + $0x118] sm:$0xff] %v211_v35 }
  0x5c   : > { %276 = vst [vmem:[%s840_s28 + $0x120] sm:$0xff] %v212_v36  ;;  %277 = vst [vmem:[%s840_s28 + $0x128] sm:$0xff] %v213_v37 }
  0x5d   : > { %278 = vst [vmem:[%s840_s28 + $0x130] sm:$0xff] %v214_v38  ;;  %340 = vst [vmem:[%s848_s20 + $0x120] sm:$0xff] %v212_v36 }
  0x5e   : > { %341 = vst [vmem:[%s848_s20 + $0x128] sm:$0xff] %v213_v37  ;;  %342 = vst [vmem:[%s848_s20 + $0x130] sm:$0xff] %v214_v38 }
  0x5f   : > { %279 = vst [vmem:[%s840_s28 + $0x138] sm:$0xff] %v215_v39  ;;  %280 = vst [vmem:[%s840_s28 + $0x140] sm:$0xff] %v216_v40 }
  0x60   : > { %281 = vst [vmem:[%s840_s28 + $0x148] sm:$0xff] %v217_v41  ;;  %343 = vst [vmem:[%s848_s20 + $0x138] sm:$0xff] %v215_v39 }
  0x61   : > { %344 = vst [vmem:[%s848_s20 + $0x140] sm:$0xff] %v216_v40  ;;  %345 = vst [vmem:[%s848_s20 + $0x148] sm:$0xff] %v217_v41 }
  0x62   : > { %282 = vst [vmem:[%s840_s28 + $0x150] sm:$0xff] %v218_v42  ;;  %283 = vst [vmem:[%s840_s28 + $0x158] sm:$0xff] %v219_v43 }
  0x63   : > { %284 = vst [vmem:[%s840_s28 + $0x160] sm:$0xff] %v220_v44  ;;  %346 = vst [vmem:[%s848_s20 + $0x150] sm:$0xff] %v218_v42 }
  0x64   : > { %347 = vst [vmem:[%s848_s20 + $0x158] sm:$0xff] %v219_v43  ;;  %348 = vst [vmem:[%s848_s20 + $0x160] sm:$0xff] %v220_v44 }
  0x65   : > { %285 = vst [vmem:[%s840_s28 + $0x168] sm:$0xff] %v221_v45  ;;  %286 = vst [vmem:[%s840_s28 + $0x170] sm:$0xff] %v222_v46 }
  0x66   : > { %287 = vst [vmem:[%s840_s28 + $0x178] sm:$0xff] %v223_v47  ;;  %349 = vst [vmem:[%s848_s20 + $0x168] sm:$0xff] %v221_v45 }
  0x67   : > { %350 = vst [vmem:[%s848_s20 + $0x170] sm:$0xff] %v222_v46  ;;  %351 = vst [vmem:[%s848_s20 + $0x178] sm:$0xff] %v223_v47 }
  0x68   : > { %288 = vst [vmem:[%s840_s28 + $0x180] sm:$0xff] %v224_v48  ;;  %289 = vst [vmem:[%s840_s28 + $0x188] sm:$0xff] %v225_v49 }
  0x69   : > { %290 = vst [vmem:[%s840_s28 + $0x190] sm:$0xff] %v226_v50  ;;  %352 = vst [vmem:[%s848_s20 + $0x180] sm:$0xff] %v224_v48 }
  0x6a   : > { %353 = vst [vmem:[%s848_s20 + $0x188] sm:$0xff] %v225_v49  ;;  %354 = vst [vmem:[%s848_s20 + $0x190] sm:$0xff] %v226_v50 }
  0x6b   : > { %291 = vst [vmem:[%s840_s28 + $0x198] sm:$0xff] %v227_v51  ;;  %292 = vst [vmem:[%s840_s28 + $0x1a0] sm:$0xff] %v228_v52 }
  0x6c   : > { %293 = vst [vmem:[%s840_s28 + $0x1a8] sm:$0xff] %v229_v53  ;;  %355 = vst [vmem:[%s848_s20 + $0x198] sm:$0xff] %v227_v51 }
  0x6d   : > { %356 = vst [vmem:[%s848_s20 + $0x1a0] sm:$0xff] %v228_v52  ;;  %357 = vst [vmem:[%s848_s20 + $0x1a8] sm:$0xff] %v229_v53 }
  0x6e   : > { %294 = vst [vmem:[%s840_s28 + $0x1b0] sm:$0xff] %v230_v54  ;;  %295 = vst [vmem:[%s840_s28 + $0x1b8] sm:$0xff] %v231_v55 }
  0x6f   : > { %296 = vst [vmem:[%s840_s28 + $0x1c0] sm:$0xff] %v232_v56  ;;  %358 = vst [vmem:[%s848_s20 + $0x1b0] sm:$0xff] %v230_v54 }
  0x70   : > { %359 = vst [vmem:[%s848_s20 + $0x1b8] sm:$0xff] %v231_v55  ;;  %360 = vst [vmem:[%s848_s20 + $0x1c0] sm:$0xff] %v232_v56 }
  0x71   : > { %297 = vst [vmem:[%s840_s28 + $0x1c8] sm:$0xff] %v233_v57  ;;  %298 = vst [vmem:[%s840_s28 + $0x1d0] sm:$0xff] %v234_v58 }
  0x72   : > { %299 = vst [vmem:[%s840_s28 + $0x1d8] sm:$0xff] %v235_v59  ;;  %361 = vst [vmem:[%s848_s20 + $0x1c8] sm:$0xff] %v233_v57 }
  0x73   : > { %362 = vst [vmem:[%s848_s20 + $0x1d0] sm:$0xff] %v234_v58  ;;  %363 = vst [vmem:[%s848_s20 + $0x1d8] sm:$0xff] %v235_v59 }
  0x74   : > { %300 = vst [vmem:[%s840_s28 + $0x1e0] sm:$0xff] %v236_v60  ;;  %301 = vst [vmem:[%s840_s28 + $0x1e8] sm:$0xff] %v237_v61 }
  0x75   : > { %302 = vst [vmem:[%s840_s28 + $0x1f0] sm:$0xff] %v238_v62  ;;  %364 = vst [vmem:[%s848_s20 + $0x1e0] sm:$0xff] %v236_v60 }
  0x76   : > { %365 = vst [vmem:[%s848_s20 + $0x1e8] sm:$0xff] %v237_v61  ;;  %366 = vst [vmem:[%s848_s20 + $0x1f0] sm:$0xff] %v238_v62 }
  0x77   : > { %303 = vst [vmem:[%s840_s28 + $0x1f8] sm:$0xff] %v239_v63  ;;  %367 = vst [vmem:[%s848_s20 + $0x1f8] sm:$0xff] %v239_v63 }
  0x78   : > { %625 = shalt.err (!%p622_p10)
}
  0x79   : > { %s626_s13 = scalar_lea.hbm %s1013_s8, 8192  ;;  %s630_s28 = scalar_lea.hbm %s1125_s1, 16384 }
  0x7a   : > { %p627_p0 = scmp.ne.s32.totalorder %s1013_s8, %s626_s13  ;;  %p631_p1 = scmp.lt.s32.totalorder %s1013_s8, %s1125_s1 }
  0x7b   : > { %p632_p3 = scmp.lt.s32.totalorder %s630_s28, %s626_s13 }
  0x7c   : > { %p628_p2 = pnand %p627_p0, %p1135_p12 }
  0x7d   : > { %p633_p6 = por %p632_p3, %p631_p1 }
  0x7e   : > { %p629_p9 = pneg %p628_p2 }
  0x80   : > { %p634_p11 = pnand %p633_p6, %p629_p9 }
  0x82   : > { %637 = shalt.err (!%p634_p11)
}
  0x83   : > { %s712_s4 = smov 128   ;;  %s713_s7 = smov 8  }
  0x84   : > { %531 = dma.vmem_to_hbm [thread:$0]  (%p1135_p12), %s1027_s3, 8192, %s1013_s8, %s369_s23, %s712_s4, %s712_s4, %s713_s7  }
  0x85   : > { %s374_s16 = scalar_lea.sflag [#allocation7], %s827_s27  ;;  %s638_s17 = scalar_lea.vmem %s1052_s14, 8192 }
  0x86   : > { %p639_p13 = scmp.ne.s32.totalorder %s1052_s14, %s638_s17  ;;  %s714_s24 = smov [#allocation6]  }
  0x87   : > { %s642_s25 = sshll.u32 %s714_s24, 4  ;;  %s643_s25 = int_to_ptr.vmem [resolvable:$false] %s642_s25 }
  0x88   : > { %p640_p4 = pnand %p639_p13, %p1135_p12  ;;  %s644_s26 = scalar_lea.vmem %s643_s25, 16384 }
  0x89   : > { %p645_p7 = scmp.lt.s32.totalorder %s1052_s14, %s643_s25  ;;  %p646_p8 = scmp.lt.s32.totalorder %s644_s26, %s638_s17 }
  0x8a   : > { %p641_p5 = pneg %p640_p4 }
  0x8b   : > { %p647_p10 = por %p646_p8, %p645_p7 }
  0x8d   : > { %p648_p0 = pnand %p647_p10, %p641_p5 }
  0x8f   : > { %651 = shalt.err (!%p648_p0)
}
  0x90   : > { %s652_s3 = scalar_lea.hbm %s1050_s19, 8192  ;;  %s656_s23 = scalar_lea.hbm %s1126_s2, 16384 }
  0x91   : > { %p653_p2 = scmp.ne.s32.totalorder %s1050_s19, %s652_s3  ;;  %p657_p3 = scmp.lt.s32.totalorder %s1050_s19, %s1126_s2 }
  0x92   : > { %p658_p6 = scmp.lt.s32.totalorder %s656_s23, %s652_s3 }
  0x93   : > { %p654_p9 = pnand %p653_p2, %p1135_p12 }
  0x94   : > { %p659_p11 = por %p658_p6, %p657_p3 }
  0x95   : > { %p655_p1 = pneg %p654_p9 }
  0x97   : > { %p660_p13 = pnand %p659_p11, %p655_p1 }
  0x99   : > { %663 = shalt.err (!%p660_p13)
}
  0x9a   : > { %532 = dma.vmem_to_hbm [thread:$0]  (%p1135_p12), %s1052_s14, 8192, %s1050_s19, %s374_s16, %s712_s4, %s712_s4, %s713_s7  }
  0x9b PF: > { %s418_s5 = sand.u32 1, %s694_s9   ;;  %p1136_p4 = scmp.ne.s32.totalorder %s1132_s22, 0 }
  0x9c   : > { %p1137_p5 = scmp.ge.s32.totalorder %s706_s12, 2  ;;  %s419_s6 = scalar_lea.sflag [#allocation4], %s418_s5 }
  0x9e   : > { %p540_p7 = pnand %p1137_p5, %p1136_p4 }
  0xa0   : > { %p541_p8 = pneg %p540_p7 }
  0xa2   : > { %685 = dma.done.wait (%p541_p8), %s419_s6, 8192  }
  0xa3   : > { %687 = vsyncadd (%p541_p8), %s419_s6, 4294959104  ;;  %s428_s28 = scalar_lea.sflag [#allocation7], %s418_s5 }
  0xa4   : > { %689 = dma.done.wait (%p541_p8), %s428_s28, 8192  }
  0xa5   : > { %691 = vsyncadd (%p541_p8), %s428_s28, 4294959104  ;;  %p19_p12 = scmp.ge.s32.totalorder %s755_s15, 4   ;;  %s1138_s9 = smov %s698_s10 }
  0xa6   : > { %s1139_s10 = smov %s702_s11  ;;  %s1140_s11 = smov %s767_s18 }
  0xa7   : > { %s1141_s12 = smov %s755_s15  ;;  %21 = sbr.rel (!%p19_p12) target bundleno = 7 (0x7), region = 86 }
  0xac   :  { %433 = vsyncpa [#allocation3], 1 }
  0xad   :  { %435 = vsyncpa [#allocation3 + $0x1], 1 }
  0xae   :  { %436 = vsyncpa [#allocation4], 1 }
  0xaf   :  { %438 = vsyncpa [#allocation4 + $0x1], 1 }
  0xb0   :  { %439 = vsyncpa [#allocation7], 1 }
  0xb1   :  { %441 = vsyncpa [#allocation7 + $0x1], 1 }

</bundles_post_ra>
